<compile_context>
chip_gen: v7x
topology: tpu7x:2x2x1
jax: 0.10.0
libtpu: 0.0.40
codegen_flags: <defaults>
</compile_context>

<pallas_src>
import jax
import jax.numpy as jnp
from jax.experimental import pallas as pl
from jax.experimental.pallas import tpu as pltpu


def _round_up(x, m):
    return (x + m - 1) // m * m


def _critic_kernel(s_ref, a_ref, w1s_ref, w1a_ref, b1_ref, w2_ref, b2_ref,
                   w3_ref, b3_ref, q_ref):
    # fc1: split matmul replaces concat([state, action], 1) @ W1 (no HBM concat).
    s = s_ref[...].astype(jnp.bfloat16)
    a = a_ref[...].astype(jnp.bfloat16)
    h1 = jnp.dot(s, w1s_ref[...], preferred_element_type=jnp.float32)
    h1 = h1 + jnp.dot(a, w1a_ref[...], preferred_element_type=jnp.float32)
    h1 = jnp.maximum(h1 + b1_ref[...], 0.0)                       # f32 bias + ReLU
    # fc2
    h2 = jnp.dot(h1.astype(jnp.bfloat16), w2_ref[...],
                 preferred_element_type=jnp.float32)
    h2 = jnp.maximum(h2 + b2_ref[...], 0.0)                       # f32 bias + ReLU
    # q head (fc2 -> 1): VPU multiply + lane reduce instead of an N=1 MXU matmul.
    q_col = jnp.sum(h2 * w3_ref[...], axis=-1, keepdims=True) + b3_ref[...]  # (tb, 1)
    # Lane-dense store: write the q column as a row of the (1, tile_b) output block
    # so the writeback is an unmasked vst instead of masked last-dim-1 partial stores.
    q_ref[0, :] = q_col[:, 0].astype(q_ref.dtype)


def critic_forward(state, action, kparams, *, tile_b=1024):
    """state: (B, obs_dims), action: (B, actions_dims) -> q: (B, 1) float32."""
    w1s, w1a, b1, w2, b2, w3r, b3 = kparams
    B, obs = state.shape
    act = action.shape[1]

    if B <= tile_b:
        # Gridless: whole problem (weights ~141 KiB bf16 + tiny activations) fits VMEM.
        vmem = pl.BlockSpec(memory_space=pltpu.MemorySpace.VMEM)
        q_row = pl.pallas_call(
            _critic_kernel,
            out_shape=jax.ShapeDtypeStruct((1, B), jnp.float32),
            in_specs=[vmem] * 9,
            out_specs=vmem,
        )(state, action, w1s, w1a, b1, w2, b2, w3r, b3)
        return q_row.reshape(B, 1)

    # Batched: 1-D grid over batch. Cap the tile so there are >= 2 grid steps (v7x can
    # then shard across both TensorCores); keep tile a multiple of 128 (lane-dense out).
    tb = max(128, min(tile_b, _round_up(pl.cdiv(B, 2), 128)))
    n_tiles = pl.cdiv(B, tb)          # ragged last block: no wrapper-side pad copy
    Bp = n_tiles * tb

    def resident(shape):
        # Weights stay VMEM-resident: constant index_map => DMA'd once, never re-fetched.
        return pl.BlockSpec(shape, lambda i: (0, 0))

    q_row = pl.pallas_call(
        _critic_kernel,
        out_shape=jax.ShapeDtypeStruct((1, Bp), jnp.float32),
        grid=(n_tiles,),
        in_specs=[
            pl.BlockSpec((tb, obs), lambda i: (i, 0)),
            pl.BlockSpec((tb, act), lambda i: (i, 0)),
            resident(w1s.shape), resident(w1a.shape), resident(b1.shape),
            resident(w2.shape), resident(b2.shape),
            resident(w3r.shape), resident(b3.shape),
        ],
        out_specs=pl.BlockSpec((1, tb), lambda i: (0, i)),
        compiler_params=pltpu.CompilerParams(
            dimension_semantics=("parallel",),
            vmem_limit_bytes=32 * 1024 * 1024,   # v5e default is 16 MiB; stay safe
        ),
    )(state, action, w1s, w1a, b1, w2, b2, w3r, b3)
    # Padded / ragged rows hold garbage q values; they never escape this slice.
    return q_row[0, :B].reshape(B, 1)


def init_params(key, obs_dims, actions_dims, fc1_dims=256, fc2_dims=256):
    """PyTorch nn.Linear-style uniform init; weights stored as (in, out)."""
    d_in = obs_dims + actions_dims
    ks = jax.random.split(key, 6)

    def linear(kw, kb, fan_in, fan_out):
        bound = 1.0 / (fan_in ** 0.5)
        w = jax.random.uniform(kw, (fan_in, fan_out), jnp.float32, -bound, bound)
        b = jax.random.uniform(kb, (1, fan_out), jnp.float32, -bound, bound)
        return w, b

    w1, b1 = linear(ks[0], ks[1], d_in, fc1_dims)
    w2, b2 = linear(ks[2], ks[3], fc1_dims, fc2_dims)
    w3, b3 = linear(ks[4], ks[5], fc2_dims, 1)
    return (w1, b1, w2, b2, w3, b3)


def prepare_params(raw_params, obs_dims):
    """One-time repack into kernel layout: split/bf16 matmul weights, lane-dense w3 row."""
    w1, b1, w2, b2, w3, b3 = raw_params
    w1s = w1[:obs_dims].astype(jnp.bfloat16)       # (obs, fc1)
    w1a = w1[obs_dims:].astype(jnp.bfloat16)       # (act, fc1)
    w2b = w2.astype(jnp.bfloat16)                  # (fc1, fc2)
    w3r = jnp.transpose(w3)                        # (1, fc2), f32, lane-dense
    return (w1s, w1a, b1, w2b, b2, w3r, b3)


def reference_bf16(state, action, kparams):
    """Plain-JAX reference with the same precision policy as the kernel."""
    w1s, w1a, b1, w2, b2, w3r, b3 = kparams
    s = state.astype(jnp.bfloat16)
    a = action.astype(jnp.bfloat16)
    h1 = (jnp.dot(s, w1s, preferred_element_type=jnp.float32)
          + jnp.dot(a, w1a, preferred_element_type=jnp.float32))
    h1 = jnp.maximum(h1 + b1, 0.0)
    h2 = jnp.dot(h1.astype(jnp.bfloat16), w2, preferred_element_type=jnp.float32)
    h2 = jnp.maximum(h2 + b2, 0.0)
    return jnp.sum(h2 * w3r, axis=-1, keepdims=True) + b3


def reference_f32(state, action, raw_params):
    """Full-f32 reference matching the PyTorch module exactly."""
    w1, b1, w2, b2, w3, b3 = raw_params
    x = jnp.concatenate([state, action], axis=1)
    h1 = jnp.maximum(x @ w1 + b1, 0.0)
    h2 = jnp.maximum(h1 @ w2 + b2, 0.0)
    return h2 @ w3 + b3


if __name__ == "__main__":
    key = jax.random.PRNGKey(0)
    k_param, k_s, k_a, k_s2, k_a2 = jax.random.split(key, 5)

    B, OBS, ACT, FC1, FC2 = 8, 16, 4, 256, 256

    raw = init_params(k_param, OBS, ACT, FC1, FC2)
    kparams = prepare_params(raw, OBS)

    state = jax.random.normal(k_s, (B, OBS), jnp.float32)
    action = jax.random.normal(k_a, (B, ACT), jnp.float32)

    # Small-batch (gridless) path.
    q = critic_forward(state, action, kparams)
    jax.block_until_ready(q)
    assert q.shape == (B, 1)
    assert jnp.allclose(q, reference_bf16(state, action, kparams), atol=1e-4, rtol=1e-4)
    assert jnp.allclose(q, reference_f32(state, action, raw), atol=3e-2, rtol=3e-2)

    # Batched (grid over batch) path: small tile to exercise the grid, the >=2-tile cap,
    # and the ragged (un-padded) last block (300 rows with tb=128 -> 3 tiles, Bp=384).
    B2 = 300
    state2 = jax.random.normal(k_s2, (B2, OBS), jnp.float32)
    action2 = jax.random.normal(k_a2, (B2, ACT), jnp.float32)
    q2 = critic_forward(state2, action2, kparams, tile_b=128)
    jax.block_until_ready(q2)
    assert q2.shape == (B2, 1)
    assert jnp.allclose(q2, reference_bf16(state2, action2, kparams), atol=1e-4, rtol=1e-4)
    assert jnp.allclose(q2, reference_f32(state2, action2, raw), atol=3e-2, rtol=3e-2)

    print("KERNEL_OK")
</pallas_src>

<mosaic_0001>
module attributes {stable_mosaic.version = 11 : i64} {
  func.func @_critic_kernel(%arg0: memref<8x16xf32, #tpu.memory_space<vmem>>, %arg1: memref<8x4xf32, #tpu.memory_space<vmem>>, %arg2: memref<16x256xbf16, #tpu.memory_space<vmem>>, %arg3: memref<4x256xbf16, #tpu.memory_space<vmem>>, %arg4: memref<1x256xf32, #tpu.memory_space<vmem>>, %arg5: memref<256x256xbf16, #tpu.memory_space<vmem>>, %arg6: memref<1x256xf32, #tpu.memory_space<vmem>>, %arg7: memref<1x256xf32, #tpu.memory_space<vmem>>, %arg8: memref<1x1xf32, #tpu.memory_space<vmem>>, %arg9: memref<1x8xf32, #tpu.memory_space<vmem>>) attributes {dimension_semantics = [], scalar_prefetch = 0 : i64, scratch_operands = 0 : i64, tpu.core_type = #tpu.core_type<tc>} {
    %c0 = arith.constant 0 : index
    %c0_0 = arith.constant 0 : index
    %0 = vector.load %arg0[%c0, %c0_0] : memref<8x16xf32, #tpu.memory_space<vmem>>, vector<8x16xf32>
    %1 = arith.truncf %0 : vector<8x16xf32> to vector<8x16xbf16>
    %c0_1 = arith.constant 0 : index
    %c0_2 = arith.constant 0 : index
    %2 = vector.load %arg1[%c0_1, %c0_2] : memref<8x4xf32, #tpu.memory_space<vmem>>, vector<8x4xf32>
    %3 = arith.truncf %2 : vector<8x4xf32> to vector<8x4xbf16>
    %c0_3 = arith.constant 0 : index
    %c0_4 = arith.constant 0 : index
    %4 = vector.load %arg2[%c0_3, %c0_4] : memref<16x256xbf16, #tpu.memory_space<vmem>>, vector<16x256xbf16>
    %cst = arith.constant dense<0.000000e+00> : vector<8x256xf32>
    %5 = tpu.matmul %1, %4, %cst {dimension_numbers = #tpu.dot_dimension_numbers<[1], [0], [0], [1], [0, 0, 1, 1], [], []>} : vector<8x16xbf16>, vector<16x256xbf16>, vector<8x256xf32> -> vector<8x256xf32>
    %c0_5 = arith.constant 0 : index
    %c0_6 = arith.constant 0 : index
    %6 = vector.load %arg3[%c0_5, %c0_6] : memref<4x256xbf16, #tpu.memory_space<vmem>>, vector<4x256xbf16>
    %cst_7 = arith.constant dense<0.000000e+00> : vector<8x256xf32>
    %7 = tpu.matmul %3, %6, %cst_7 {dimension_numbers = #tpu.dot_dimension_numbers<[1], [0], [0], [1], [0, 0, 1, 1], [], []>} : vector<8x4xbf16>, vector<4x256xbf16>, vector<8x256xf32> -> vector<8x256xf32>
    %8 = arith.addf %5, %7 : vector<8x256xf32>
    %c0_8 = arith.constant 0 : index
    %c0_9 = arith.constant 0 : index
    %9 = vector.load %arg4[%c0_8, %c0_9] : memref<1x256xf32, #tpu.memory_space<vmem>>, vector<1x256xf32>
    %10 = vector.broadcast %9 : vector<1x256xf32> to vector<8x256xf32>
    %11 = arith.addf %8, %10 : vector<8x256xf32>
    %cst_10 = arith.constant 0.000000e+00 : f32
    %12 = vector.broadcast %cst_10 : f32 to vector<8x256xf32>
    %13 = arith.maximumf %11, %12 : vector<8x256xf32>
    %14 = arith.truncf %13 : vector<8x256xf32> to vector<8x256xbf16>
    %c0_11 = arith.constant 0 : index
    %c0_12 = arith.constant 0 : index
    %15 = vector.load %arg5[%c0_11, %c0_12] : memref<256x256xbf16, #tpu.memory_space<vmem>>, vector<256x256xbf16>
    %cst_13 = arith.constant dense<0.000000e+00> : vector<8x256xf32>
    %16 = tpu.matmul %14, %15, %cst_13 {dimension_numbers = #tpu.dot_dimension_numbers<[1], [0], [0], [1], [0, 0, 1, 1], [], []>} : vector<8x256xbf16>, vector<256x256xbf16>, vector<8x256xf32> -> vector<8x256xf32>
    %c0_14 = arith.constant 0 : index
    %c0_15 = arith.constant 0 : index
    %17 = vector.load %arg6[%c0_14, %c0_15] : memref<1x256xf32, #tpu.memory_space<vmem>>, vector<1x256xf32>
    %18 = vector.broadcast %17 : vector<1x256xf32> to vector<8x256xf32>
    %19 = arith.addf %16, %18 : vector<8x256xf32>
    %cst_16 = arith.constant 0.000000e+00 : f32
    %20 = vector.broadcast %cst_16 : f32 to vector<8x256xf32>
    %21 = arith.maximumf %19, %20 : vector<8x256xf32>
    %c0_17 = arith.constant 0 : index
    %c0_18 = arith.constant 0 : index
    %22 = vector.load %arg7[%c0_17, %c0_18] : memref<1x256xf32, #tpu.memory_space<vmem>>, vector<1x256xf32>
    %23 = vector.broadcast %22 : vector<1x256xf32> to vector<8x256xf32>
    %24 = arith.mulf %21, %23 : vector<8x256xf32>
    %cst_19 = arith.constant dense<0.000000e+00> : vector<8xf32>
    %25 = vector.multi_reduction <add>, %24, %cst_19 [1] : vector<8x256xf32> to vector<8xf32>
    %26 = vector.shape_cast %25 : vector<8xf32> to vector<8x1xf32>
    %c0_20 = arith.constant 0 : index
    %c0_21 = arith.constant 0 : index
    %27 = vector.load %arg8[%c0_20, %c0_21] : memref<1x1xf32, #tpu.memory_space<vmem>>, vector<1x1xf32>
    %28 = vector.broadcast %27 : vector<1x1xf32> to vector<8x1xf32>
    %29 = arith.addf %26, %28 : vector<8x1xf32>
    %30 = vector.shape_cast %29 : vector<8x1xf32> to vector<8xf32>
    %c0_22 = arith.constant 0 : index
    %c0_23 = arith.constant 0 : index
    %31 = vector.load %arg9[%c0_22, %c0_23] : memref<1x8xf32, #tpu.memory_space<vmem>>, vector<1x8xf32>
    %32 = vector.shape_cast %31 : vector<1x8xf32> to vector<8xf32>
    %33 = vector.shape_cast %30 : vector<8xf32> to vector<1x8xf32>
    tpu.vector_store %arg9[%c0_22, %c0_23], %33 {strides = array<i32>} : memref<1x8xf32, #tpu.memory_space<vmem>>, vector<1x8xf32>,
    return
  }
}

</mosaic_0001>

<bundles_post_ra>
// kernel: tpu_custom_call.1
= control target key start
LH: loop header
LB: loop body
LE: loop exit
PB: predicated region body
PF: predicated region fallthrough
CT: control target
= control target key end

     0   :  { %s796_s0 = inlined_call_operand.hbm [shape: f32[8,16], index: 0, kind: input, shape index: {}]   ;;  %s797_s1 = inlined_call_operand.vmem [shape: f32[8,4], index: 1, kind: input, shape index: {}]   ;;  %s798_s2 = inlined_call_operand.vmem [shape: bf16[16,256], index: 2, kind: input, shape index: {}]   ;;  %s799_s3 = inlined_call_operand.vmem [shape: bf16[4,256], index: 3, kind: input, shape index: {}]   ;;  %s800_s4 = inlined_call_operand.vmem [shape: f32[1,256], index: 4, kind: input, shape index: {}]   ;;  %s801_s5 = inlined_call_operand.hbm [shape: bf16[256,256], index: 5, kind: input, shape index: {}]   ;;  %s802_s6 = inlined_call_operand.vmem [shape: f32[1,256], index: 6, kind: input, shape index: {}]   ;;  %s803_s7 = inlined_call_operand.vmem [shape: f32[1,256], index: 7, kind: input, shape index: {}]   ;;  %s804_s8 = inlined_call_operand.<no memory space> [shape: f32[1,1], index: 8, kind: input, shape index: {}]   ;;  %s805_s9 = inlined_call_operand.hbm [shape: f32[1,8], index: 9, kind: output, shape index: {}]  }
   0x1   :  { %v14_v0 = vstv %s804_s8 }
   0x2   :  { %15 = vst [vmem:[#allocation2] sm:$0x1] %v14_v0 }
   0x3   :  { %16 = vsyncpa [#allocation4], 0 }
   0x4   :  { %17 = vsyncpa [#allocation7], 0 }
   0x5   :  { %18 = vsyncpa [#allocation5], 0  ;;  %s673_s11 = smov [#allocation3]   ;;  %s674_s13 = smov [#allocation6]  }
   0x6   :  { %s25_s12 = sshll.u32 %s673_s11, 4  ;;  %s42_s14 = sshll.u32 %s674_s13, 4  ;;  %s26_s12 = int_to_ptr.vmem [resolvable:$true] %s25_s12  ;;  %s732_s14 = int_to_ptr.vmem [resolvable:$true] %s42_s14 }
   0x7   :  { %s601_s17 = scalar_lea.hbm %s796_s0, 128 }
   0x8   :  { %p602_p0 = scmp.ne.s32.totalorder %s796_s0, %s601_s17  ;;  %p605_p1 = scmp.lt.u32.totalorder %s601_s17, %s796_s0 }
   0xa   :  { %p607_p2 = pnand %p605_p1, %p602_p0 }
   0xc   :  { %610 = shalt.err (!%p607_p2)
}
   0xd   :  { %s611_s21 = scalar_lea.vmem %s26_s12, 128  ;;  %p616_p4 = scmp.lt.s32.totalorder %s26_s12, %s26_s12 }
   0xe   :  { %p612_p3 = scmp.ne.s32.totalorder %s26_s12, %s611_s21  ;;  %p617_p5 = scmp.lt.s32.totalorder %s611_s21, %s611_s21 }
  0x10   :  { %p618_p6 = por %p617_p5, %p616_p4 }
  0x12   :  { %p619_p7 = pnand %p618_p6, %p612_p3 }
  0x14   :  { %622 = shalt.err (!%p619_p7)
}
  0x15   :  { %28 = dma.hbm_to_vmem [thread:$0]  %s796_s0, 128, %s26_s12, [#allocation4]  }
  0x16   :  { %s623_s26 = scalar_lea.hbm %s801_s5, 4096 }
  0x17   :  { %p624_p8 = scmp.ne.s32.totalorder %s801_s5, %s623_s26  ;;  %p627_p9 = scmp.lt.u32.totalorder %s623_s26, %s801_s5 }
  0x19   :  { %p629_p10 = pnand %p627_p9, %p624_p8 }
  0x1b   :  { %632 = shalt.err (!%p629_p10)
}
  0x1c   :  { %s633_s10 = scalar_lea.vmem %s732_s14, 4096  ;;  %p638_p12 = scmp.lt.s32.totalorder %s732_s14, %s732_s14 }
  0x1d   :  { %p634_p11 = scmp.ne.s32.totalorder %s732_s14, %s633_s10  ;;  %p639_p13 = scmp.lt.s32.totalorder %s633_s10, %s633_s10 }
  0x1f   :  { %p640_p0 = por %p639_p13, %p638_p12 }
  0x21   :  { %p641_p1 = pnand %p640_p0, %p634_p11 }
  0x23   :  { %644 = shalt.err (!%p641_p1)
}
  0x24   :  { %s675_s0 = smov 128   ;;  %s676_s11 = smov 8  }
  0x25   :  { %48 = dma.hbm_to_vmem [thread:$0]  %s801_s5, 4096, %s732_s14, [#allocation7], %s675_s0, %s675_s0, %s676_s11  }
  0x26   :  { %667 = dma.done.wait [#allocation4], 128  }
  0x27   :  { %668 = vsyncadd [#allocation4], 4294967168 }
  0x28   :  { %669 = dma.done.wait [#allocation7], 4096  }
  0x29   :  { %670 = vsyncadd [#allocation7], 4294963200  ;;  %v677_v1 = vmov 0   ;;  %vm82_vm0 = vcmask 1041408   ;;  %v64_v3 = vld [vmem:[%s797_s1] sm:$0xff]  ;;  %vm78_vm1 = vcmask 31744   ;;  %v187_v43 = vlaneseq }
  0x2a   :  { %121 = vmatprep.mubr.bf16.mxu1 %v677_v1  ;;  %549 = vset.pattern.permute.xlu0 %v677_v1  ;;  %v504_v2 = vld.sshfl [vmem:[%s799_s3] sm:$0x33 pattern:$0x76325410]  ;;  %v552_v6 = vld [vmem:[%s798_s2 + $0x4] ss:$8 sps:$4 sm:$0xff]   ;;  %v65_v7 = vpack.c.bf16 %v64_v3, %v64_v3 }
  0x2b   :  { %v77_v4 = vcombine.high %v504_v2, %v504_v2  ;;  %v84_v5 = vsel %vm82_vm0, %v504_v2, 0  ;;  %v553_v8 = vld [vmem:[#allocation6 + $0x4] ss:$8 sps:$4 sm:$0xff]   ;;  %v555_v9 = vld [vmem:[#allocation6] ss:$8 sps:$4 sm:$0xff]   ;;  %v62_v14 = vld [vmem:[#allocation3] sm:$0xff] }
  0x2c   :  { %v550_v10 = vld [vmem:[%s798_s2] ss:$8 sps:$4 sm:$0xff]   ;;  %407 = vmatprep.subr.bf16.mxu0 %v553_v8  ;;  %v559_v13 = vld [vmem:[#allocation6 + $0x24] ss:$8 sps:$4 sm:$0xff]   ;;  %v63_v16 = vpack.c.bf16 %v62_v14, %v62_v14  ;;  %vm140_vm2 = vcmask 130048   ;;  %v188_v44 = vshrl.u32 %v187_v43, 7 }
  0x2d   :  { %505 = vmatprep.subr.msk.bf16.mxu1 %vm82_vm0, %v77_v4  ;;  %v556_v11 = vld [vmem:[#allocation6 + $0x14] ss:$8 sps:$4 sm:$0xff]   ;;  %408 = vmatpush1.bf16.msra.mxu0 %v555_v9  ;;  %v558_v12 = vld [vmem:[#allocation6 + $0x10] ss:$8 sps:$4 sm:$0xff]   ;;  %v561_v15 = vld [vmem:[#allocation6 + $0x20] ss:$8 sps:$4 sm:$0xff]  }
  0x2e   :  { %90 = vmatpush1.bf16.msra.mxu1 %v84_v5  ;;  %409 = vmatprep.subr.bf16.mxu0 %v556_v11  ;;  %v562_v17 = vld [vmem:[#allocation6 + $0x34] ss:$8 sps:$4 sm:$0xff]   ;;  %v564_v18 = vld [vmem:[#allocation6 + $0x30] ss:$8 sps:$4 sm:$0xff]   ;;  %v565_v19 = vld [vmem:[#allocation6 + $0x44] ss:$8 sps:$4 sm:$0xff]  }
  0x2f   :  { %144 = vmatprep.subr.bf16.mxu1 %v552_v6  ;;  %v567_v20 = vld [vmem:[#allocation6 + $0x40] ss:$8 sps:$4 sm:$0xff]   ;;  %v568_v21 = vld [vmem:[#allocation6 + $0x54] ss:$8 sps:$4 sm:$0xff]   ;;  %v570_v22 = vld [vmem:[#allocation6 + $0x50] ss:$8 sps:$4 sm:$0xff]  }
  0x30   :  { %v571_v23 = vld [vmem:[#allocation6 + $0x64] ss:$8 sps:$4 sm:$0xff]   ;;  %v573_v24 = vld [vmem:[#allocation6 + $0x60] ss:$8 sps:$4 sm:$0xff]   ;;  %v574_v25 = vld [vmem:[#allocation6 + $0x74] ss:$8 sps:$4 sm:$0xff]  }
  0x31   :  { %506 = vmatmul.mubr.msk.bf16.vlgmr.msra.gmra.mrb[0].mxu1 %vm78_vm1, %v65_v7  ;;  %410 = vmatpush1.bf16.msra.mxu0 %v558_v12  ;;  %v576_v26 = vld [vmem:[#allocation6 + $0x70] ss:$8 sps:$4 sm:$0xff]   ;;  %v577_v27 = vld [vmem:[#allocation6 + $0x84] ss:$8 sps:$4 sm:$0xff]   ;;  %v579_v28 = vld [vmem:[#allocation6 + $0x80] ss:$8 sps:$4 sm:$0xff]  }
  0x32   :  { %145 = vmatpush1.bf16.msra.mxu1 %v550_v10  ;;  %176 = vmatprep.mubr.bf16.mxu1 %v677_v1  ;;  %v580_v29 = vld [vmem:[#allocation6 + $0x94] ss:$8 sps:$4 sm:$0xff]   ;;  %v582_v30 = vld [vmem:[#allocation6 + $0x90] ss:$8 sps:$4 sm:$0xff]   ;;  %v583_v31 = vld [vmem:[#allocation6 + $0xa4] ss:$8 sps:$4 sm:$0xff]  }
  0x33   :  { %411 = vmatprep.subr.bf16.mxu0 %v559_v13  ;;  %v585_v32 = vld [vmem:[#allocation6 + $0xa0] ss:$8 sps:$4 sm:$0xff]   ;;  %v586_v33 = vld [vmem:[#allocation6 + $0xb4] ss:$8 sps:$4 sm:$0xff]   ;;  %v588_v34 = vld [vmem:[#allocation6 + $0xb0] ss:$8 sps:$4 sm:$0xff]  }
  0x34   :  { %v589_v35 = vld [vmem:[#allocation6 + $0xc4] ss:$8 sps:$4 sm:$0xff]   ;;  %v591_v36 = vld [vmem:[#allocation6 + $0xc0] ss:$8 sps:$4 sm:$0xff]   ;;  %v592_v37 = vld [vmem:[#allocation6 + $0xd4] ss:$8 sps:$4 sm:$0xff]  }
  0x35   :  { %412 = vmatpush1.bf16.msra.mxu0 %v561_v15  ;;  %v594_v38 = vld [vmem:[#allocation6 + $0xd0] ss:$8 sps:$4 sm:$0xff]   ;;  %v595_v39 = vld [vmem:[#allocation6 + $0xe4] ss:$8 sps:$4 sm:$0xff]   ;;  %v597_v40 = vld [vmem:[#allocation6 + $0xe0] ss:$8 sps:$4 sm:$0xff]  }
  0x36   :  { %413 = vmatprep.subr.bf16.mxu0 %v562_v17  ;;  %v598_v41 = vld [vmem:[#allocation6 + $0xf4] ss:$8 sps:$4 sm:$0xff]   ;;  %v600_v42 = vld [vmem:[#allocation6 + $0xf0] ss:$8 sps:$4 sm:$0xff]   ;;  %v189_v49 = vsub.s32 0, %v188_v44  ;;  %v193_v51 = vsub.s32 1, %v188_v44 }
  0x37   :  { %v185_v50 = vld [vmem:[%s800_s4] sm:$0x3]  ;;  %vm486_vm3 = vcmask 57344  }
  0x38   :  { %v190_v52 = vrot.slane %v185_v50, %v189_v49  ;;  %v194_v54 = vrot.slane %v185_v50, %v193_v51  ;;  %v235_v2 = vld [vmem:[%s802_s6] sm:$0x3]  ;;  %s678_s6 = smov [#allocation8]  }
  0x39   :  { %509 = vmatmul.mubr.msk.bf16.vlgmr.msra.gmra.mrb[4].mxu1 %vm140_vm2, %v63_v16  ;;  %414 = vmatpush1.bf16.msra.mxu0 %v564_v18  ;;  %v240_v3 = vrot.slane %v235_v2, %v189_v49  ;;  %v244_v4 = vrot.slane %v235_v2, %v193_v51  ;;  %v450_v5 = vld [vmem:[%s803_s7] sm:$0x3]  ;;  %s494_s7 = sshll.u32 %s678_s6, 4  ;;  %s495_s7 = int_to_ptr.vmem [resolvable:$true] %s494_s7 }
  0x3a   :  { %415 = vmatprep.subr.bf16.mxu0 %v565_v19  ;;  %v455_v9 = vrot.slane %v450_v5, %v189_v49  ;;  %v459_v12 = vrot.slane %v450_v5, %v193_v51  ;;  %v542_v19 = vld [vmem:[#allocation2] ss:$0 sm:$0xff]  ;;  %s645_s22 = scalar_lea.vmem %s495_s7, 16  ;;  %s649_s23 = scalar_lea.vmem %s495_s7, 32 }
  0x3b   :  { %p646_p2 = scmp.ne.s32.totalorder %s495_s7, %s645_s22  ;;  %p650_p3 = scmp.lt.s32.totalorder %s495_s7, %s495_s7 }
  0x3c   :  { %p651_p4 = scmp.lt.s32.totalorder %s649_s23, %s645_s22 }
  0x3d   :  { %416 = vmatpush1.bf16.msra.mxu0 %v567_v20 }
  0x3e   :  { %417 = vmatprep.subr.bf16.mxu0 %v568_v21  ;;  %p652_p5 = por %p651_p4, %p650_p3 }
  0x40   :  { %p653_p6 = pnand %p652_p5, %p646_p2 }
  0x41   :  { %418 = vmatpush1.bf16.msra.mxu0 %v570_v22  ;;  %v480_v22 = vand.u32 127, %v187_v43 }
  0x42   :  { %419 = vmatprep.subr.bf16.mxu0 %v571_v23 }
  0x43   :  { %v483_v23 = vsub.s32 %v480_v22, %v188_v44 }
  0x45   :  { %420 = vmatpush1.bf16.msra.mxu0 %v573_v24 }
  0x46   :  { %421 = vmatprep.subr.bf16.mxu0 %v574_v25 }
  0x49   :  { %422 = vmatpush1.bf16.msra.mxu0 %v576_v26 }
  0x4a   :  { %423 = vmatprep.subr.bf16.mxu0 %v577_v27 }
  0x4d   :  { %424 = vmatpush1.bf16.msra.mxu0 %v579_v28 }
  0x4e   :  { %425 = vmatprep.subr.bf16.mxu0 %v580_v29 }
  0x51   :  { %426 = vmatpush1.bf16.msra.mxu0 %v582_v30 }
  0x52   :  { %427 = vmatprep.subr.bf16.mxu0 %v583_v31 }
  0x55   :  { %428 = vmatpush1.bf16.msra.mxu0 %v585_v32 }
  0x56   :  { %429 = vmatprep.subr.bf16.mxu0 %v586_v33 }
  0x59   :  { %430 = vmatpush1.bf16.msra.mxu0 %v588_v34 }
  0x5a   :  { %431 = vmatprep.subr.bf16.mxu0 %v589_v35 }
  0x5d   :  { %432 = vmatpush1.bf16.msra.mxu0 %v591_v36 }
  0x5e   :  { %433 = vmatprep.subr.bf16.mxu0 %v592_v37 }
  0x61   :  { %434 = vmatpush1.bf16.msra.mxu0 %v594_v38 }
  0x62   :  { %435 = vmatprep.subr.bf16.mxu0 %v595_v39 }
  0x65   :  { %436 = vmatpush1.bf16.msra.mxu0 %v597_v40 }
  0x66   :  { %437 = vmatprep.subr.bf16.mxu0 %v598_v41 }
  0x69   :  { %438 = vmatpush1.bf16.msra.mxu0 %v600_v42 }
 0x104   :  { %v123_v45 = vpop.f32.mrb[0].mxu1 }
 0x105   :  { %v125_v46 = vpop.f32.mrb[1].mxu1 }
 0x106   :  { %v127_v47 = vpop.f32.mrb[2].mxu1 }
 0x107   :  { %v128_v48 = vpop.f32.mrb[3].mxu1 }
 0x10c   :  { %v178_v53 = vpop.f32.mrb[4].mxu1 }
 0x10d   :  { %v179_v55 = vadd.f32 %v178_v53, %v123_v45  ;;  %v180_v56 = vpop.f32.mrb[5].mxu1 }
 0x10e   :  { %v181_v57 = vadd.f32 %v180_v56, %v125_v46  ;;  %v182_v58 = vpop.f32.mrb[6].mxu1 }
 0x10f   :  { %v197_v59 = vadd.f32 %v190_v52, %v179_v55  ;;  %v183_v60 = vpop.f32.mrb[7].mxu1 }
 0x110   :  { %v198_v61 = vadd.f32 %v194_v54, %v181_v57 }
 0x111   :  { %v199_v62 = vmax.f32 %v197_v59, 0.0 }
 0x112   :  { %v200_v63 = vmax.f32 %v198_v61, 0.0 }
 0x113   :  { %v201_v1 = vpack.c.bf16 %v199_v62, %v199_v62 }
 0x114   :  { %v202_v0 = vpack.c.bf16 %v200_v63, %v200_v63 }
 0x116   :  { %439 = vmatprep.mubr.bf16.mxu0 %v202_v0 }
 0x117   :  { %440 = vmatmul.mubr.bf16.vlgmr.msra.gmra.mrb[0].mxu0 %v201_v1 }
 0x1ea   :  { %v441_v6 = vpop.f32.mrb[0].mxu0 }
 0x1eb   :  { %v442_v7 = vadd.f32 %v441_v6, %v240_v3  ;;  %v443_v8 = vpop.f32.mrb[1].mxu0 }
 0x1ec   :  { %v444_v10 = vadd.f32 %v443_v8, %v244_v4  ;;  %v445_v11 = vpop.f32.mrb[2].mxu0 }
 0x1ed   :  { %v448_v13 = vmax.f32 %v442_v7, 0.0  ;;  %v446_v14 = vpop.f32.mrb[3].mxu0 }
 0x1ee   :  { %v449_v15 = vmax.f32 %v444_v10, 0.0 }
 0x1ef   :  { %v462_v16 = vmul.f32 %v455_v9, %v448_v13 }
 0x1f0   :  { %v463_v17 = vmul.f32 %v459_v12, %v449_v15 }
 0x1f2   :  { %v464_v18 = vadd.f32 %v463_v17, %v462_v16 }
 0x1f4   :  { %465 = vadd.xlane.f32.xlu0 %v464_v18 }
 0x281   :  { %v466_v20 = vpop.xlane.xlu0 %465 }
 0x282   :  { %v474_v21 = vadd.f32 %v542_v19, %v466_v20 }
 0x284   :  { %477 = vperm.xlu0 %549, %v474_v21  }
 0x303   :  { %v478_v24 = vpop.permute.xlu0 %477 }
 0x304   :  { %v484_v25 = vrot.slane %v478_v24, %v483_v23 }
 0x306   :  { %487 = vst.msk [vmem:[#allocation8] sm:$0x1] %vm486_vm3, %v484_v25 }
 0x307   :  { %656 = shalt.err (!%p653_p6)
}
 0x308   :  { %s657_s26 = scalar_lea.hbm %s805_s9, 16 }
 0x309   :  { %p658_p7 = scmp.ne.s32.totalorder %s805_s9, %s657_s26  ;;  %p661_p8 = scmp.lt.u32.totalorder %s657_s26, %s805_s9 }
 0x30b   :  { %p663_p9 = pnand %p661_p8, %p658_p7 }
 0x30d   :  { %666 = shalt.err (!%p663_p9)
}
 0x30e   :  { %497 = dma.vmem_to_hbm [thread:$0]  %s495_s7, 16, %s805_s9, [#allocation5]  }
 0x30f   :  { %671 = dma.done.wait [#allocation5], 16  }
 0x310   :  { %672 = vsyncadd [#allocation5], 4294967280 }
 0x311   :  { %501 = vsyncpa [#allocation4], 1 }
 0x312   :  { %502 = vsyncpa [#allocation7], 1 }
 0x313   :  { %503 = vsyncpa [#allocation5], 1 }

</bundles_post_ra>
